<compile_context>
chip_gen: v5e
topology: v5e:2x2
jax: 0.10.0
libtpu: 0.0.40
codegen_flags: <defaults>
</compile_context>

<pallas_src>
import jax
import jax.numpy as jnp
from jax.experimental import pallas as pl
from jax.experimental.pallas import tpu as pltpu


def _predictor_kernel(x_ref, w1_ref, b1_ref, w2_ref, b2_ref, o_ref):
    """One batch tile of the fused forward pass.

    x_ref : (TB, F)    input rows
    w1_ref: (F, H)     first Linear weight with BN scale folded in
    b1_ref: (1, H)     first Linear bias with BN scale/shift folded in
    w2_ref: (1, H)     second Linear weight as a row vector
    b2_ref: (1, 1)     second Linear bias
    o_ref : (1, 1, TB) lane-dense output slab (batch on the lane axis)
    """
    # Linear(F, H) with BatchNorm (eval) folded in, then ReLU.  Dropout(eval) == identity.
    h = jnp.dot(x_ref[...], w1_ref[...], preferred_element_type=jnp.float32)
    h = jnp.maximum(h + b1_ref[...], 0.0)
    # Linear(H, 1): an N=1 matmul wastes the MXU — do a VPU multiply + lane reduction.
    logits = jnp.sum(h * w2_ref[...], axis=-1) + b2_ref[0, 0]
    # Sigmoid (rides the EUP slot), stored lane-dense.
    o_ref[0, 0, :] = jax.nn.sigmoid(logits)


def _round_up(n, m):
    return ((n + m - 1) // m) * m


def simple_round2_predictor(x, params):
    """Fused eval-mode forward pass. x: (B, F) float32. Returns (B,) float32."""
    B, F = x.shape
    w1, b1, gamma, beta, run_mean, run_var, w2, b2 = params
    H = w1.shape[1]
    eps = 1e-5

    # Fold BatchNorm1d (eval, running stats) into the first Linear.
    bn_scale = gamma / jnp.sqrt(run_var + eps)                        # (H,)
    w1_f = (w1 * bn_scale[None, :]).astype(jnp.float32)               # (F, H)
    b1_f = ((b1 - run_mean) * bn_scale + beta).astype(jnp.float32)    # (H,)

    # Batch tile: multiple of 128 (lane-dense output), sublane aligned, capped at 512.
    TB = min(512, _round_up(B, 128))
    B_pad = _round_up(B, TB)
    G = pl.cdiv(B_pad, TB)

    x_p = x.astype(jnp.float32)
    if B_pad != B:
        # Pad with zeros; padded rows produce garbage outputs that are sliced off below.
        x_p = jnp.pad(x_p, ((0, B_pad - B), (0, 0)))

    out = pl.pallas_call(
        _predictor_kernel,
        out_shape=jax.ShapeDtypeStruct((G, 1, TB), jnp.float32),
        grid=(G,),
        in_specs=[
            pl.BlockSpec((TB, F), lambda i: (i, 0)),    # x tile (auto double-buffered)
            pl.BlockSpec((F, H), lambda i: (0, 0)),     # w1 (VMEM-resident across tiles)
            pl.BlockSpec((1, H), lambda i: (0, 0)),     # b1
            pl.BlockSpec((1, H), lambda i: (0, 0)),     # w2 row
            pl.BlockSpec((1, 1), lambda i: (0, 0)),     # b2
        ],
        out_specs=pl.BlockSpec((1, 1, TB), lambda i: (i, 0, 0)),
        compiler_params=pltpu.CompilerParams(
            dimension_semantics=("parallel",)),
    )(
        x_p,
        w1_f,
        b1_f.reshape(1, H),
        w2.reshape(1, H).astype(jnp.float32),
        b2.reshape(1, 1).astype(jnp.float32),
    )
    return out.reshape(B_pad)[:B]               # matches .squeeze() for B > 1


def init_params(key, input_size, hidden_size=32):
    """Deterministic synthetic parameter init (shapes match the nn.Module)."""
    k1, k2, k3, k4 = jax.random.split(key, 4)
    lim1 = 1.0 / jnp.sqrt(input_size)
    lim2 = 1.0 / jnp.sqrt(hidden_size)
    w1 = jax.random.uniform(k1, (input_size, hidden_size), jnp.float32, -lim1, lim1)
    b1 = jax.random.uniform(k2, (hidden_size,), jnp.float32, -lim1, lim1)
    # BatchNorm1d defaults: weight=1, bias=0, running_mean=0, running_var=1
    gamma = jnp.ones((hidden_size,), jnp.float32)
    beta = jnp.zeros((hidden_size,), jnp.float32)
    run_mean = jnp.zeros((hidden_size,), jnp.float32)
    run_var = jnp.ones((hidden_size,), jnp.float32)
    w2 = jax.random.uniform(k3, (hidden_size, 1), jnp.float32, -lim2, lim2)
    b2 = jax.random.uniform(k4, (1,), jnp.float32, -lim2, lim2)
    return (w1, b1, gamma, beta, run_mean, run_var, w2, b2)


def reference_forward(x, params):
    """Plain-JAX reference of the same eval-mode forward pass."""
    w1, b1, gamma, beta, run_mean, run_var, w2, b2 = params
    eps = 1e-5
    h = x @ w1 + b1
    h = (h - run_mean) / jnp.sqrt(run_var + eps) * gamma + beta
    h = jnp.maximum(h, 0.0)
    logits = h @ w2 + b2
    return jax.nn.sigmoid(logits).squeeze(-1)


if __name__ == "__main__":
    key = jax.random.PRNGKey(0)
    kx, kp = jax.random.split(key)

    B, F, H = 8, 16, 32
    x = jax.random.normal(kx, (B, F), dtype=jnp.float32)
    params = init_params(kp, F, H)

    y = simple_round2_predictor(x, params)
    y = jax.block_until_ready(y)

    y_ref = reference_forward(x, params)
    assert y.shape == (B,)
    assert jnp.allclose(y, y_ref, atol=1e-5, rtol=1e-5)

    print("KERNEL_OK")
</pallas_src>

<mosaic_0001>
module attributes {stable_mosaic.version = 11 : i64} {
  func.func @_predictor_kernel(%arg0: i32, %arg1: memref<128x16xf32, #tpu.memory_space<vmem>>, %arg2: memref<16x32xf32, #tpu.memory_space<vmem>>, %arg3: memref<1x32xf32, #tpu.memory_space<vmem>>, %arg4: memref<1x32xf32, #tpu.memory_space<vmem>>, %arg5: memref<1x1xf32, #tpu.memory_space<vmem>>, %arg6: memref<1x1x128xf32, #tpu.memory_space<vmem>>) attributes {dimension_semantics = [#tpu.dimension_semantics<parallel>], iteration_bounds = array<i64: 1>, scalar_prefetch = 0 : i64, scratch_operands = 0 : i64, tpu.core_type = #tpu.core_type<tc>, window_params = [{transform_indices = @transform_0, window_bounds = array<i64: 128, 16>}, {pipeline_mode = #tpu.pipeline_mode<synchronous>, transform_indices = @transform_1, window_bounds = array<i64: 16, 32>}, {pipeline_mode = #tpu.pipeline_mode<synchronous>, transform_indices = @transform_2, window_bounds = array<i64: 1, 32>}, {pipeline_mode = #tpu.pipeline_mode<synchronous>, transform_indices = @transform_3, window_bounds = array<i64: 1, 32>}, {pipeline_mode = #tpu.pipeline_mode<synchronous>, transform_indices = @transform_4, window_bounds = array<i64: 1, 1>}, {transform_indices = @transform_5, window_bounds = array<i64: 1, 1, 128>}]} {
    %c0 = arith.constant 0 : index
    %c0_0 = arith.constant 0 : index
    %0 = vector.load %arg1[%c0, %c0_0] : memref<128x16xf32, #tpu.memory_space<vmem>>, vector<128x16xf32>
    %c0_1 = arith.constant 0 : index
    %c0_2 = arith.constant 0 : index
    %1 = vector.load %arg2[%c0_1, %c0_2] : memref<16x32xf32, #tpu.memory_space<vmem>>, vector<16x32xf32>
    %cst = arith.constant dense<0.000000e+00> : vector<128x32xf32>
    %2 = tpu.matmul %0, %1, %cst {dimension_numbers = #tpu.dot_dimension_numbers<[1], [0], [0], [1], [0, 0, 1, 1], [], []>} : vector<128x16xf32>, vector<16x32xf32>, vector<128x32xf32> -> vector<128x32xf32>
    %c0_3 = arith.constant 0 : index
    %c0_4 = arith.constant 0 : index
    %3 = vector.load %arg3[%c0_3, %c0_4] : memref<1x32xf32, #tpu.memory_space<vmem>>, vector<1x32xf32>
    %4 = vector.broadcast %3 : vector<1x32xf32> to vector<128x32xf32>
    %5 = arith.addf %2, %4 : vector<128x32xf32>
    %cst_5 = arith.constant 0.000000e+00 : f32
    %6 = vector.broadcast %cst_5 : f32 to vector<128x32xf32>
    %7 = arith.maximumf %5, %6 : vector<128x32xf32>
    %c0_6 = arith.constant 0 : index
    %c0_7 = arith.constant 0 : index
    %8 = vector.load %arg4[%c0_6, %c0_7] : memref<1x32xf32, #tpu.memory_space<vmem>>, vector<1x32xf32>
    %9 = vector.broadcast %8 : vector<1x32xf32> to vector<128x32xf32>
    %10 = arith.mulf %7, %9 : vector<128x32xf32>
    %cst_8 = arith.constant dense<0.000000e+00> : vector<128xf32>
    %11 = vector.multi_reduction <add>, %10, %cst_8 [1] : vector<128x32xf32> to vector<128xf32>
    %c0_9 = arith.constant 0 : index
    %c0_10 = arith.constant 0 : index
    %12 = vector.load %arg5[%c0_9, %c0_10] : memref<1x1xf32, #tpu.memory_space<vmem>>, vector<1x1xf32>
    %13 = vector.extract %12[0, 0] : f32 from vector<1x1xf32>
    %14 = vector.broadcast %13 : f32 to vector<128xf32>
    %15 = arith.addf %11, %14 : vector<128xf32>
    %16 = arith.negf %15 : vector<128xf32>
    %17 = math.exp %16 : vector<128xf32>
    %cst_11 = arith.constant 1.000000e+00 : f32
    %18 = vector.broadcast %cst_11 : f32 to vector<128xf32>
    %19 = arith.addf %18, %17 : vector<128xf32>
    %20 = arith.divf %18, %19 : vector<128xf32>
    %c0_12 = arith.constant 0 : index
    %c0_13 = arith.constant 0 : index
    %c0_14 = arith.constant 0 : index
    %21 = vector.load %arg6[%c0_12, %c0_13, %c0_14] : memref<1x1x128xf32, #tpu.memory_space<vmem>>, vector<1x1x128xf32>
    %22 = vector.shape_cast %21 : vector<1x1x128xf32> to vector<128xf32>
    %23 = vector.shape_cast %20 : vector<128xf32> to vector<1x1x128xf32>
    tpu.vector_store %arg6[%c0_12, %c0_13, %c0_14], %23 {strides = array<i32>} : memref<1x1x128xf32, #tpu.memory_space<vmem>>, vector<1x1x128xf32>,
    return
  }
  func.func @transform_0(%arg0: i32) -> (i32, i32) {
    %c0_i32 = arith.constant 0 : i32
    %c0_i32_0 = arith.constant 0 : i32
    return %arg0, %c0_i32 : i32, i32
  }
  func.func @transform_1(%arg0: i32) -> (i32, i32) {
    %c0_i32 = arith.constant 0 : i32
    %c0_i32_0 = arith.constant 0 : i32
    %c0_i32_1 = arith.constant 0 : i32
    return %c0_i32, %c0_i32_0 : i32, i32
  }
  func.func @transform_2(%arg0: i32) -> (i32, i32) {
    %c0_i32 = arith.constant 0 : i32
    %c0_i32_0 = arith.constant 0 : i32
    %c0_i32_1 = arith.constant 0 : i32
    return %c0_i32, %c0_i32_0 : i32, i32
  }
  func.func @transform_3(%arg0: i32) -> (i32, i32) {
    %c0_i32 = arith.constant 0 : i32
    %c0_i32_0 = arith.constant 0 : i32
    %c0_i32_1 = arith.constant 0 : i32
    return %c0_i32, %c0_i32_0 : i32, i32
  }
  func.func @transform_4(%arg0: i32) -> (i32, i32) {
    %c0_i32 = arith.constant 0 : i32
    %c0_i32_0 = arith.constant 0 : i32
    %c0_i32_1 = arith.constant 0 : i32
    return %c0_i32, %c0_i32_0 : i32, i32
  }
  func.func @transform_5(%arg0: i32) -> (i32, i32, i32) {
    %c0_i32 = arith.constant 0 : i32
    %c0_i32_0 = arith.constant 0 : i32
    %c0_i32_1 = arith.constant 0 : i32
    return %arg0, %c0_i32, %c0_i32_0 : i32, i32, i32
  }
}

</mosaic_0001>

<bundles_post_ra>
// kernel: tpu_custom_call.1
= control target key start
LH: loop header
LB: loop body
LE: loop exit
PB: predicated region body
PF: predicated region fallthrough
CT: control target
= control target key end

     0   :  { %s1495_s0 = inlined_call_operand.vmem [shape: f32[128,16], index: 0, kind: input, shape index: {}]   ;;  %s1496_s1 = inlined_call_operand.vmem [shape: f32[16,32], index: 1, kind: input, shape index: {}]   ;;  %s1497_s2 = inlined_call_operand.vmem [shape: f32[1,32], index: 2, kind: input, shape index: {}]   ;;  %s1498_s3 = inlined_call_operand.vmem [shape: f32[1,32], index: 3, kind: input, shape index: {}]   ;;  %s1499_s4 = inlined_call_operand.<no memory space> [shape: f32[1,1], index: 4, kind: input, shape index: {}]   ;;  %s1500_s5 = inlined_call_operand.hbm [shape: f32[1,1,128], index: 5, kind: output, shape index: {}]  }
   0x1   :  { %v10_v0 = vstv %s1499_s4 }
   0x2   :  { %11 = vst [vmem:[#allocation2] sm:$0x1] %v10_v0 }
   0x3   :  { %v40_v1 = vld [vmem:[%s1496_s1 + $0x8] sm:$0xff]  ;;  %v39_v2 = vld [vmem:[%s1496_s1] sm:$0xff]  ;;  %vm45_vm0 = vcmask 130048  }
   0x4   :  { %108 = vmatpush.msra.mxu0 %v40_v1  ;;  %696 = vmatpush.msra.mxu1 %v40_v1  ;;  %v23_v3 = vld [vmem:[%s1495_s0] sm:$0xff] }
   0x5   :  { %697 = vmatpush.msra.mxu2 %v40_v1  ;;  %v27_v4 = vld [vmem:[%s1495_s0 + $0x20] sm:$0xff]  ;;  %698 = vmatpush.msra.mxu3 %v40_v1 }
   0x6   :  { %v31_v5 = vld [vmem:[%s1495_s0 + $0x40] sm:$0xff]  ;;  %109 = vmatpush.msra.mxu0 %v39_v2  ;;  %699 = vmatpush.msra.mxu1 %v39_v2 }
   0x7   :  { %700 = vmatpush.msra.mxu2 %v39_v2  ;;  %664 = vmatmul.msk.f32.vlgmr.msra.gmra.mxu0 %vm45_vm0, %v23_v3  ;;  %v35_v6 = vld [vmem:[%s1495_s0 + $0x60] sm:$0xff] }
   0x8   :  { %668 = vmatmul.msk.f32.vlgmr.msra.gmra.mxu1 %vm45_vm0, %v27_v4  ;;  %672 = vmatmul.msk.f32.vlgmr.msra.gmra.mxu2 %vm45_vm0, %v31_v5 }
   0x9   :  { %701 = vmatpush.msra.mxu3 %v39_v2 }
   0xa   :  { %676 = vmatmul.msk.f32.vlgmr.msra.gmra.mxu3 %vm45_vm0, %v35_v6 }
   0xb   :  { %12 = vsyncpa [#allocation4], 0  ;;  %v24_v7 = vld [vmem:[%s1495_s0 + $0x8] sm:$0xff]  ;;  %v25_v11 = vld [vmem:[%s1495_s0 + $0x10] sm:$0xff]  ;;  %vm195_vm1 = vcmask 261120   ;;  %vm588_vm14 = vcmask 130112  }
   0xc   :  { %v32_v8 = vld [vmem:[%s1495_s0 + $0x48] sm:$0xff]  ;;  %v33_v12 = vld [vmem:[%s1495_s0 + $0x50] sm:$0xff]  ;;  %v26_v15 = vld [vmem:[%s1495_s0 + $0x18] sm:$0xff]  ;;  %s655_s8 = sshll.u32 %s1500_s5, 4  ;;  %s656_s8 = int_to_ptr.hbm [resolvable:$true] %s655_s8 }
   0xd   :  { %v28_v9 = vld [vmem:[%s1495_s0 + $0x28] sm:$0xff]  ;;  %v29_v13 = vld [vmem:[%s1495_s0 + $0x30] sm:$0xff]  ;;  %v34_v16 = vld [vmem:[%s1495_s0 + $0x58] sm:$0xff] }
   0xe   :  { %v36_v10 = vld [vmem:[%s1495_s0 + $0x68] sm:$0xff]  ;;  %v37_v14 = vld [vmem:[%s1495_s0 + $0x70] sm:$0xff]  ;;  %v30_v17 = vld [vmem:[%s1495_s0 + $0x38] sm:$0xff] }
   0xf   :  { %665 = vmatmul.msk.f32.gmra.mxu0 %vm45_vm0, %v24_v7  ;;  %v38_v18 = vld [vmem:[%s1495_s0 + $0x78] sm:$0xff]  ;;  %v904_v19 = vld [vmem:[%s1497_s2] ss:$0 sm:$0xff]  ;;  %s797_s2 = smov [#allocation3]  }
  0x10   :  { %673 = vmatmul.msk.f32.gmra.mxu2 %vm45_vm0, %v32_v8  ;;  %669 = vmatmul.msk.f32.gmra.mxu1 %vm45_vm0, %v28_v9  ;;  %v910_v23 = vld [vmem:[%s1498_s3] ss:$0 sm:$0xff]  ;;  %s653_s3 = sshll.u32 %s797_s2, 4  ;;  %s654_s3 = int_to_ptr.vmem [resolvable:$true] %s653_s3 }
  0x11   :  { %v244_v0 = vld [vmem:[#allocation2] sm:$0x1] }
  0x12   :  { %677 = vmatmul.msk.f32.gmra.mxu3 %vm45_vm0, %v36_v10  ;;  %702 = vpush %v244_v0 }
  0x17   :  { %666 = vmatmul.msk.f32.gmra.mxu0 %vm45_vm0, %v25_v11 }
  0x18   :  { %674 = vmatmul.msk.f32.gmra.mxu2 %vm45_vm0, %v33_v12  ;;  %670 = vmatmul.msk.f32.gmra.mxu1 %vm45_vm0, %v29_v13 }
  0x1a   :  { %678 = vmatmul.msk.f32.gmra.mxu3 %vm45_vm0, %v37_v14 }
  0x1f   :  { %667 = vmatmul.msk.f32.gmra.mxu0 %vm45_vm0, %v26_v15 }
  0x20   :  { %675 = vmatmul.msk.f32.gmra.mxu2 %vm45_vm0, %v34_v16  ;;  %671 = vmatmul.msk.f32.gmra.mxu1 %vm45_vm0, %v30_v17 }
  0x22   :  { %679 = vmatmul.msk.f32.gmra.mxu3 %vm45_vm0, %v38_v18 }
  0x43   :  { %s703_s0 = spop %702 }
  0x84   :  { %v111_v20 = vpop.f32.mrf.mxu0 }
  0x85   :  { %v112_v21 = vadd.f32 %v904_v19, %v111_v20  ;;  %v123_v22 = vpop.f32.mrf.mxu1 }
  0x86   :  { %v124_v24 = vadd.f32 %v904_v19, %v123_v22 }
  0x87   :  { %v159_v25 = vmax.f32 %v112_v21, 0.0 }
  0x88   :  { %v163_v26 = vmax.f32 %v124_v24, 0.0 }
  0x89   :  { %v179_v27 = vmul.f32 %v910_v23, %v159_v25 }
  0x8a   :  { %v183_v28 = vmul.f32 %v910_v23, %v163_v26 }
  0x8b   :  { %v135_v29 = vpop.f32.mrf.mxu2  ;;  %v196_v30 = vsel %vm195_vm1, %v179_v27, 0.0 }
  0x8c   :  { %v136_v31 = vadd.f32 %v904_v19, %v135_v29  ;;  %v208_v32 = vsel %vm195_vm1, %v183_v28, 0.0  ;;  %v114_v33 = vpop.f32.mrf.mxu0  ;;  %197 = vadd.xlane.f32.xlu0 %v196_v30 }
  0x8d   :  { %209 = vadd.xlane.f32.xlu2 %v208_v32  ;;  %v115_v34 = vadd.f32 %v904_v19, %v114_v33  ;;  %v126_v35 = vpop.f32.mrf.mxu1  ;;  %v147_v36 = vpop.f32.mrf.mxu3 }
  0x8e   :  { %v167_v37 = vmax.f32 %v136_v31, 0.0  ;;  %v127_v38 = vadd.f32 %v904_v19, %v126_v35  ;;  %v148_v5 = vadd.f32 %v904_v19, %v147_v36 }
  0x8f   :  { %v160_v39 = vmax.f32 %v115_v34, 0.0 }
  0x90   :  { %v187_v40 = vmul.f32 %v910_v23, %v167_v37  ;;  %v164_v42 = vmax.f32 %v127_v38, 0.0  ;;  %v171_v11 = vmax.f32 %v148_v5, 0.0 }
  0x91   :  { %v180_v41 = vmul.f32 %v910_v23, %v160_v39 }
  0x92   :  { %v220_v43 = vsel %vm195_vm1, %v187_v40, 0.0  ;;  %v184_v53 = vmul.f32 %v910_v23, %v164_v42  ;;  %v191_v21 = vmul.f32 %v910_v23, %v171_v11  ;;  %v959_v40 = vstv %s703_s0 }
  0x93   :  { %v138_v44 = vpop.f32.mrf.mxu2  ;;  %v199_v45 = vsel %vm195_vm1, %v180_v41, 0.0 }
  0x94   :  { %v139_v46 = vadd.f32 %v904_v19, %v138_v44  ;;  %v117_v47 = vpop.f32.mrf.mxu0  ;;  %200 = vadd.xlane.f32.xlu0 %v199_v45  ;;  %v211_v58 = vsel %vm195_vm1, %v184_v53, 0.0  ;;  %v232_v29 = vsel %vm195_vm1, %v191_v21, 0.0 }
  0x95   :  { %221 = vadd.xlane.f32.xlu2 %v220_v43  ;;  %v118_v48 = vadd.f32 %v904_v19, %v117_v47  ;;  %v129_v49 = vpop.f32.mrf.mxu1  ;;  %v150_v50 = vpop.f32.mrf.mxu3 }
  0x96   :  { %v168_v51 = vmax.f32 %v139_v46, 0.0  ;;  %v130_v52 = vadd.f32 %v904_v19, %v129_v49  ;;  %v151_v33 = vadd.f32 %v904_v19, %v150_v50 }
  0x97   :  { %v161_v54 = vmax.f32 %v118_v48, 0.0 }
  0x98   :  { %v188_v55 = vmul.f32 %v910_v23, %v168_v51  ;;  %v165_v56 = vmax.f32 %v130_v52, 0.0  ;;  %v172_v37 = vmax.f32 %v151_v33, 0.0 }
  0x99   :  { %v181_v57 = vmul.f32 %v910_v23, %v161_v54 }
  0x9a   :  { %v223_v59 = vsel %vm195_vm1, %v188_v55, 0.0  ;;  %v185_v3 = vmul.f32 %v910_v23, %v165_v56  ;;  %v192_v38 = vmul.f32 %v910_v23, %v172_v37 }
  0x9b   :  { %v141_v60 = vpop.f32.mrf.mxu2  ;;  %v202_v61 = vsel %vm195_vm1, %v181_v57, 0.0 }
  0x9c   :  { %v142_v62 = vadd.f32 %v904_v19, %v141_v60  ;;  %203 = vadd.xlane.f32.xlu1 %v202_v61  ;;  %224 = vadd.xlane.f32.xlu0 %v223_v59  ;;  %v120_v63 = vpop.f32.mrf.mxu0  ;;  %v214_v8 = vsel %vm195_vm1, %v185_v3, 0.0  ;;  %v235_v39 = vsel %vm195_vm1, %v192_v38, 0.0  ;;  %v583_v61 = vlaneseq }
  0x9d   :  { %212 = vadd.xlane.f32.xlu2 %v211_v58  ;;  %v121_v1 = vadd.f32 %v904_v19, %v120_v63  ;;  %v153_v2 = vpop.f32.mrf.mxu3  ;;  %v132_v10 = vpop.f32.mrf.mxu1 }
  0x9e   :  { %v169_v4 = vmax.f32 %v142_v62, 0.0  ;;  %v154_v14 = vadd.f32 %v904_v19, %v153_v2  ;;  %v133_v15 = vadd.f32 %v904_v19, %v132_v10 }
  0x9f   :  { %v162_v7 = vmax.f32 %v121_v1, 0.0 }
  0xa0   :  { %v189_v6 = vmul.f32 %v910_v23, %v169_v4  ;;  %v173_v22 = vmax.f32 %v154_v14, 0.0  ;;  %v166_v25 = vmax.f32 %v133_v15, 0.0 }
  0xa1   :  { %v182_v17 = vmul.f32 %v910_v23, %v162_v7  ;;  %v985_v7 = vand.u32 127, %v583_v61 }
  0xa2   :  { %v226_v9 = vsel %vm195_vm1, %v189_v6, 0.0  ;;  %v193_v30 = vmul.f32 %v910_v23, %v173_v22  ;;  %v186_v31 = vmul.f32 %v910_v23, %v166_v25 }
  0xa3   :  { %v144_v12 = vpop.f32.mrf.mxu2  ;;  %v205_v27 = vsel %vm195_vm1, %v182_v17, 0.0  ;;  %v991_v14 = vadd.s32 4294967264, %v985_v7 }
  0xa4   :  { %v145_v13 = vadd.f32 %v904_v19, %v144_v12  ;;  %227 = vadd.xlane.f32.xlu1 %v226_v9  ;;  %215 = vadd.xlane.f32.xlu0 %v214_v8  ;;  %v238_v34 = vsel %vm195_vm1, %v193_v30, 0.0  ;;  %v217_v35 = vsel %vm195_vm1, %v186_v31, 0.0 }
  0xa5   :  { %v156_v16 = vpop.f32.mrf.mxu3 }
  0xa6   :  { %v170_v18 = vmax.f32 %v145_v13, 0.0  ;;  %v157_v20 = vadd.f32 %v904_v19, %v156_v16 }
  0xa8   :  { %v190_v24 = vmul.f32 %v910_v23, %v170_v18  ;;  %v174_v26 = vmax.f32 %v157_v20, 0.0  ;;  %v998_v18 = vadd.s32 4294967232, %v985_v7  ;;  %v1001_v20 = vadd.s32 4294967288, %v985_v7 }
  0xaa   :  { %v229_v28 = vsel %vm195_vm1, %v190_v24, 0.0  ;;  %v194_v32 = vmul.f32 %v910_v23, %v174_v26  ;;  %v1010_v26 = vadd.s32 4294967256, %v985_v7 }
  0xab   :  { %230 = vadd.xlane.f32.xlu2 %v229_v28 }
  0xac   :  { %206 = vadd.xlane.f32.xlu1 %v205_v27  ;;  %233 = vadd.xlane.f32.xlu0 %v232_v29  ;;  %v241_v36 = vsel %vm195_vm1, %v194_v32, 0.0 }
  0xb3   :  { %239 = vadd.xlane.f32.xlu2 %v238_v34 }
  0xb4   :  { %218 = vadd.xlane.f32.xlu1 %v217_v35  ;;  %242 = vadd.xlane.f32.xlu0 %v241_v36 }
  0xbc   :  { %236 = vadd.xlane.f32.xlu1 %v235_v39 }
  0xff   :  { %v198_v41 = vpop.xlane.xlu0 %197 }
 0x100   :  { %v210_v19 = vpop.xlane.xlu2 %209  ;;  %v247_v42 = vadd.f32 %v959_v40, %v198_v41 }
 0x101   :  { %v251_v43 = vadd.f32 %v959_v40, %v210_v19 }
 0x102   :  { %v680_v44 = vmul.f32 -1.442695, %v247_v42 }
 0x103   :  { %v684_v45 = vmul.f32 -1.442695, %v251_v43 }
 0x104   :  { %707 = vpow2.f32 %v680_v44 }
 0x105   :  { %709 = vpow2.f32 %v684_v45 }
 0x107   :  { %v201_v46 = vpop.xlane.xlu0 %200 }
 0x108   :  { %v222_v47 = vpop.xlane.xlu2 %221  ;;  %v248_v23 = vadd.f32 %v959_v40, %v201_v46 }
 0x109   :  { %v255_v48 = vadd.f32 %v959_v40, %v222_v47 }
 0x10a   :  { %v708_v49 = vpop.eup %707  ;;  %v681_v50 = vmul.f32 -1.442695, %v248_v23 }
 0x10b   :  { %v710_v51 = vpop.eup %709  ;;  %v965_v52 = vadd.f32 1.0, %v708_v49  ;;  %v688_v53 = vmul.f32 -1.442695, %v255_v48 }
 0x10c   :  { %v967_v54 = vadd.f32 1.0, %v710_v51  ;;  %711 = vpow2.f32 %v681_v50 }
 0x10d   :  { %713 = vrcp.f32 %v965_v52  ;;  %v336_v22 = vand.u32 2147483647, %v965_v52  ;;  %v338_v24 = vand.u32 2147483648, %v965_v52  ;;  %vm332_vm5 = vweird.f32 %v965_v52 }
 0x10e   :  { %715 = vrcp.f32 %v967_v54  ;;  %v396_v29 = vand.u32 2147483647, %v967_v54  ;;  %v398_v30 = vand.u32 2147483648, %v967_v54  ;;  %vm392_vm3 = vweird.f32 %v967_v54 }
 0x10f   :  { %717 = vpow2.f32 %v688_v53  ;;  %v204_v55 = vpop.xlane.xlu1 %203  ;;  %v225_v56 = vpop.xlane.xlu0 %224  ;;  %vm1027_vm6 = vcmp.eq.f32.partialorder %v336_v22, 8.507059e+37  ;;  %v339_v39 = vor.u32 1.1754944e-38, %v338_v24 }
 0x110   :  { %v213_v57 = vpop.xlane.xlu2 %212  ;;  %v249_v58 = vadd.f32 %v959_v40, %v204_v55  ;;  %v256_v63 = vadd.f32 %v959_v40, %v225_v56  ;;  %vm1033_vm7 = vcmp.eq.f32.partialorder %v396_v29, 8.507059e+37  ;;  %v399_v43 = vor.u32 1.1754944e-38, %v398_v30 }
 0x111   :  { %v252_v59 = vadd.f32 %v959_v40, %v213_v57  ;;  %v1067_v56 = vadd.s32 4294967224, %v985_v7 }
 0x112   :  { %v712_v60 = vpop.eup %711  ;;  %v682_v62 = vmul.f32 -1.442695, %v249_v58  ;;  %v689_v9 = vmul.f32 -1.442695, %v256_v63 }
 0x113   :  { %v974_v0 = vpop.eup %713  ;;  %v976_v1 = vadd.f32 1.0, %v712_v60  ;;  %v685_v2 = vmul.f32 -1.442695, %v252_v59 }
 0x114   :  { %v978_v3 = vpop.eup %715  ;;  %v328_v4 = vmul.f32 %v974_v0, %v965_v52  ;;  %719 = vpow2.f32 %v682_v62  ;;  %vm333_vm2 = vweird.f32 %v974_v0 }
 0x115   :  { %v718_v5 = vpop.eup %717  ;;  %v388_v6 = vmul.f32 %v978_v3, %v967_v54  ;;  %721 = vrcp.f32 %v976_v1  ;;  %vm393_vm4 = vweird.f32 %v978_v3  ;;  %vm1039_vm8 = vmor %vm332_vm5, %vm333_vm2  ;;  %v351_v47 = vand.u32 2147483647, %v976_v1 }
 0x116   :  { %v987_v8 = vadd.f32 1.0, %v718_v5  ;;  %v329_v10 = vsub.f32 1.0, %v328_v4  ;;  %723 = vpow2.f32 %v685_v2  ;;  %vm1046_vm9 = vmor %vm392_vm3, %vm393_vm4  ;;  %v353_v23 = vand.u32 2147483648, %v976_v1 }
 0x117   :  { %v228_v11 = vpop.xlane.xlu1 %227  ;;  %v389_v12 = vsub.f32 1.0, %v388_v6  ;;  %v216_v41 = vpop.xlane.xlu0 %215  ;;  %v1062_v54 = vadd.s32 4294967280, %v985_v7  ;;  %vm347_vm10 = vweird.f32 %v976_v1  ;;  %vm1085_vm13 = vcmp.eq.f32.partialorder %v351_v47, 8.507059e+37 }
 0x118   :  { %725 = vrcp.f32 %v987_v8  ;;  %v257_v15 = vadd.f32 %v959_v40, %v228_v11  ;;  %v330_v17 = vmul.f32 %v974_v0, %v329_v10  ;;  %v458_v52 = vand.u32 2147483648, %v987_v8 }
 0x119   :  { %727 = vpow2.f32 %v689_v9  ;;  %v390_v28 = vmul.f32 %v978_v3, %v389_v12  ;;  %v253_v53 = vadd.f32 %v959_v40, %v216_v41  ;;  %vm452_vm12 = vweird.f32 %v987_v8 }
 0x11a   :  { %v720_v13 = vpop.eup %719  ;;  %v690_v34 = vmul.f32 -1.442695, %v257_v15  ;;  %v331_v35 = vadd.f32 %v974_v0, %v330_v17  ;;  %v456_v63 = vand.u32 2147483647, %v987_v8  ;;  %v354_v5 = vor.u32 1.1754944e-38, %v353_v23 }
 0x11b   :  { %v994_v16 = vpop.eup %721  ;;  %v1003_v21 = vadd.f32 1.0, %v720_v13  ;;  %v391_v19 = vadd.f32 %v978_v3, %v390_v28  ;;  %v1102_v13 = vadd.s32 4294967248, %v985_v7 }
 0x11c   :  { %v343_v25 = vmul.f32 %v994_v16, %v976_v1  ;;  %v724_v27 = vpop.eup %723  ;;  %v335_v50 = vsel %vm1039_vm8, %v974_v0, %v331_v35  ;;  %vm348_vm11 = vweird.f32 %v994_v16  ;;  %v686_v0 = vmul.f32 -1.442695, %v253_v53 }
 0x11d   :  { %729 = vrcp.f32 %v1003_v21  ;;  %v1019_v33 = vadd.f32 1.0, %v724_v27  ;;  %v395_v58 = vsel %vm1046_vm9, %v978_v3, %v391_v19  ;;  %v1080_v62 = vsel %vm1027_vm6, %v339_v39, %v335_v50  ;;  %vm1095_vm15 = vmor %vm347_vm10, %vm348_vm11 }
 0x11e   :  { %v1016_v31 = vpop.eup %725  ;;  %v344_v32 = vsub.f32 1.0, %v343_v25  ;;  %v231_v57 = vpop.xlane.xlu2 %230  ;;  %v459_v3 = vor.u32 1.1754944e-38, %v458_v52  ;;  %v1091_v9 = vsel %vm1033_vm7, %v399_v43, %v395_v58  ;;  %v585_v15 = vperm.slane %v1080_v62, %v985_v7 }
 0x11f   :  { %v448_v36 = vmul.f32 %v1016_v31, %v987_v8  ;;  %v728_v37 = vpop.eup %727  ;;  %731 = vrcp.f32 %v1019_v33  ;;  %v207_v60 = vpop.xlane.xlu1 %206  ;;  %vm1113_vm0 = vcmp.eq.f32.partialorder %v456_v63, 8.507059e+37  ;;  %v413_v25 = vand.u32 2147483648, %v1019_v33 }
 0x120   :  { %v345_v45 = vmul.f32 %v994_v16, %v344_v32  ;;  %v1052_v48 = vadd.f32 1.0, %v728_v37  ;;  %733 = vpow2.f32 %v690_v34  ;;  %vm362_vm1 = vweird.f32 %v1003_v21 }
 0x121   :  { %v449_v51 = vsub.f32 1.0, %v448_v36  ;;  %v366_v27 = vand.u32 2147483647, %v1003_v21  ;;  %v368_v28 = vand.u32 2147483648, %v1003_v21  ;;  %v258_v29 = vadd.f32 %v959_v40, %v231_v57 }
 0x122   :  { %735 = vrcp.f32 %v1052_v48  ;;  %v346_v59 = vadd.f32 %v994_v16, %v345_v45  ;;  %vm453_vm2 = vweird.f32 %v1016_v31  ;;  %v599_v34 = vperm.slane %v1091_v9, %v991_v14 }
 0x123   :  { %v1054_v49 = vpop.eup %729  ;;  %v450_v2 = vmul.f32 %v1016_v31, %v449_v51  ;;  %737 = vpow2.f32 %v686_v0  ;;  %vm407_vm3 = vweird.f32 %v1019_v33  ;;  %v411_v38 = vand.u32 2147483647, %v1019_v33  ;;  %vm1136_vm4 = vmor %vm452_vm12, %vm453_vm2 }
 0x124   :  { %v358_v55 = vmul.f32 %v1054_v49, %v1003_v21  ;;  %v350_v17 = vsel %vm1095_vm15, %v994_v16, %v346_v59  ;;  %v234_v16 = vpop.xlane.xlu0 %233  ;;  %v691_v41 = vmul.f32 -1.442695, %v258_v29  ;;  %v1140_v42 = vor.u32 1.1754944e-38, %v413_v25 }
 0x125   :  { %v1076_v61 = vpop.eup %731  ;;  %v451_v30 = vadd.f32 %v1016_v31, %v450_v2  ;;  %v355_v35 = vsel %vm1085_vm13, %v354_v5, %v350_v17  ;;  %vm363_vm5 = vweird.f32 %v1054_v49  ;;  %vm1143_vm6 = vcmp.eq.f32.partialorder %v366_v27, 8.507059e+37 }
 0x126   :  { %v734_v6 = vpop.eup %733  ;;  %v403_v11 = vmul.f32 %v1076_v61, %v1019_v33  ;;  %v359_v12 = vsub.f32 1.0, %v358_v55  ;;  %v369_v44 = vor.u32 1.1754944e-38, %v368_v28  ;;  %v471_v45 = vand.u32 2147483647, %v1052_v48  ;;  %v240_v46 = vpop.xlane.xlu2 %239  ;;  %vm1183_vm10 = vmor %vm362_vm1, %vm363_vm5 }
 0x127   :  { %v1109_v22 = vadd.f32 1.0, %v734_v6  ;;  %v455_v8 = vsel %vm1136_vm4, %v1016_v31, %v451_v30  ;;  %v587_v23 = vperm.slane %v355_v35, %v1001_v20  ;;  %v250_v50 = vadd.f32 %v959_v40, %v207_v60  ;;  %v219_v51 = vpop.xlane.xlu1 %218 }
 0x128   :  { %v1111_v1 = vpop.eup %735  ;;  %v404_v36 = vsub.f32 1.0, %v403_v11  ;;  %v360_v37 = vmul.f32 %v1054_v49, %v359_v12  ;;  %v259_v57 = vadd.f32 %v959_v40, %v234_v16  ;;  %v473_v31 = vand.u32 2147483648, %v1052_v48 }
 0x129   :  { %v463_v32 = vmul.f32 %v1111_v1, %v1052_v48  ;;  %739 = vrcp.f32 %v1109_v22  ;;  %v738_v47 = vpop.eup %737  ;;  %v683_v62 = vmul.f32 -1.442695, %v250_v50  ;;  %v261_v20 = vadd.f32 %v959_v40, %v240_v46 }
 0x12a   :  { %741 = vpow2.f32 %v691_v41  ;;  %v405_v52 = vmul.f32 %v1076_v61, %v404_v36  ;;  %v361_v53 = vadd.f32 %v1054_v49, %v360_v37  ;;  %v1155_v55 = vadd.f32 1.0, %v738_v47 }
 0x12b   :  { %v464_v39 = vsub.f32 1.0, %v463_v32  ;;  %vm408_vm7 = vweird.f32 %v1076_v61  ;;  %vm1164_vm8 = vcmp.eq.f32.partialorder %v411_v38, 8.507059e+37  ;;  %vm467_vm9 = vweird.f32 %v1052_v48 }
 0x12c   :  { %743 = vrcp.f32 %v1155_v55  ;;  %v1174_v0 = vsel %vm1113_vm0, %v459_v3, %v455_v8  ;;  %v1177_v2 = vsel %vm588_vm14, %v587_v23, %v585_v15  ;;  %vm1187_vm11 = vcmp.eq.f32.partialorder %v471_v45, 8.507059e+37  ;;  %v243_v12 = vpop.xlane.xlu0 %242  ;;  %vm1206_vm14 = vmor %vm407_vm3, %vm408_vm7 }
 0x12d   :  { %v465_v59 = vmul.f32 %v1111_v1, %v464_v39  ;;  %745 = vpow2.f32 %v683_v62  ;;  %v406_v6 = vadd.f32 %v1076_v61, %v405_v52  ;;  %v365_v3 = vsel %vm1183_vm10, %v1054_v49, %v361_v53 }
 0x12e   :  { %v692_v10 = vmul.f32 -1.442695, %v259_v57  ;;  %v694_v11 = vmul.f32 -1.442695, %v261_v20  ;;  %vm592_vm12 = vcmask 195712   ;;  %vm468_vm13 = vweird.f32 %v1111_v1 }
 0x12f   :  { %v1158_v58 = vpop.eup %739  ;;  %v466_v21 = vadd.f32 %v1111_v1, %v465_v59  ;;  %v474_v17 = vor.u32 1.1754944e-38, %v473_v31  ;;  %v615_v25 = vperm.slane %v1174_v0, %v998_v18  ;;  %v254_v28 = vadd.f32 %v959_v40, %v219_v51  ;;  %vm1221_vm15 = vmor %vm467_vm9, %vm468_vm13  ;;  %v237_v41 = vpop.xlane.xlu1 %236 }
 0x130   :  { %v478_v63 = vmul.f32 %v1158_v58, %v1109_v22  ;;  %v742_v15 = vpop.eup %741  ;;  %747 = vpow2.f32 %v692_v10  ;;  %v370_v29 = vsel %vm1143_vm6, %v369_v44, %v365_v3  ;;  %v486_v16 = vand.u32 2147483647, %v1109_v22 }
 0x131   :  { %v1199_v27 = vadd.f32 1.0, %v742_v15  ;;  %749 = vpow2.f32 %v694_v11  ;;  %v262_v30 = vadd.f32 %v959_v40, %v243_v12  ;;  %v410_v35 = vsel %vm1206_vm14, %v1076_v61, %v406_v6 }
 0x132   :  { %v479_v24 = vsub.f32 1.0, %v478_v63  ;;  %v1214_v32 = vpop.eup %743  ;;  %vm482_vm0 = vweird.f32 %v1109_v22  ;;  %v1228_v36 = vadd.s32 4294967272, %v985_v7  ;;  %v470_v38 = vsel %vm1221_vm15, %v1111_v1, %v466_v21 }
 0x133   :  { %751 = vrcp.f32 %v1199_v27  ;;  %v746_v37 = vpop.eup %745  ;;  %v418_v48 = vmul.f32 %v1214_v32, %v1155_v55  ;;  %v687_v39 = vmul.f32 -1.442695, %v254_v28  ;;  %v591_v19 = vperm.slane %v370_v29, %v1062_v54 }
 0x134   :  { %v480_v61 = vmul.f32 %v1158_v58, %v479_v24  ;;  %v488_v43 = vand.u32 2147483648, %v1109_v22  ;;  %v1238_v44 = vadd.f32 1.0, %v746_v37  ;;  %v695_v45 = vmul.f32 -1.442695, %v262_v30 }
 0x135   :  { %v1243_v46 = vsel %vm1164_vm8, %v1140_v42, %v410_v35  ;;  %vm483_vm1 = vweird.f32 %v1158_v58  ;;  %vm1246_vm2 = vcmp.eq.f32.partialorder %v486_v16, 8.507059e+37  ;;  %v419_v47 = vsub.f32 1.0, %v418_v48 }
 0x136   :  { %753 = vpow2.f32 %v687_v39  ;;  %v748_v8 = vpop.eup %747  ;;  %v1252_v54 = vsel %vm1187_vm11, %v474_v17, %v470_v38  ;;  %v426_v23 = vand.u32 2147483647, %v1155_v55  ;;  %v260_v42 = vadd.f32 %v959_v40, %v237_v41  ;;  %vm1284_vm5 = vmor %vm482_vm0, %vm483_vm1 }
 0x137   :  { %755 = vrcp.f32 %v1238_v44  ;;  %v750_v50 = vpop.eup %749  ;;  %v481_v51 = vadd.f32 %v1158_v58, %v480_v61  ;;  %v420_v52 = vmul.f32 %v1214_v32, %v419_v47  ;;  %v1259_v53 = vadd.f32 1.0, %v748_v8 }
 0x138   :  { %757 = vpow2.f32 %v695_v45  ;;  %v489_v59 = vor.u32 1.1754944e-38, %v488_v43  ;;  %vm422_vm3 = vweird.f32 %v1155_v55  ;;  %v428_v31 = vand.u32 2147483648, %v1155_v55 }
 0x139   :  { %v1261_v57 = vpop.eup %751  ;;  %v1265_v62 = vadd.f32 1.0, %v750_v50  ;;  %v421_v20 = vadd.f32 %v1214_v32, %v420_v52  ;;  %vm423_vm4 = vweird.f32 %v1214_v32  ;;  %759 = vrcp.f32 %v1259_v53 }
 0x13a   :  { %v493_v40 = vmul.f32 %v1261_v57, %v1199_v27  ;;  %v603_v60 = vperm.slane %v1243_v46, %v1010_v26  ;;  %v1276_v63 = vsel %vm592_vm12, %v591_v19, %v1177_v2  ;;  %v619_v4 = vperm.slane %v1252_v54, %v1067_v56  ;;  %vm1298_vm7 = vmor %vm422_vm3, %vm423_vm4 }
 0x13b   :  { %761 = vrcp.f32 %v1265_v62  ;;  %v485_v3 = vsel %vm1284_vm5, %v1158_v58, %v481_v51  ;;  %vm1292_vm6 = vcmp.eq.f32.partialorder %v426_v23, 8.507059e+37  ;;  %v693_v11 = vmul.f32 -1.442695, %v260_v42 }
 0x13c   :  { %v754_v6 = vpop.eup %753  ;;  %v494_v10 = vsub.f32 1.0, %v493_v40  ;;  %v429_v15 = vor.u32 1.1754944e-38, %v428_v31  ;;  %v503_v21 = vand.u32 2147483648, %v1199_v27  ;;  %v1304_v17 = vadd.s32 4294967240, %v985_v7 }
 0x13d   :  { %v756_v12 = vpop.eup %755  ;;  %v1306_v58 = vadd.f32 1.0, %v754_v6  ;;  %v425_v28 = vsel %vm1298_vm7, %v1214_v32, %v421_v20  ;;  %vm497_vm8 = vweird.f32 %v1199_v27  ;;  %v501_v55 = vand.u32 2147483647, %v1199_v27 }
 0x13e   :  { %v758_v24 = vpop.eup %757  ;;  %v373_v49 = vmul.f32 %v756_v12, %v1238_v44  ;;  %v1316_v29 = vsel %vm1246_vm2, %v489_v59, %v485_v3  ;;  %vm596_vm9 = vcmask 261312   ;;  %v381_v16 = vand.u32 2147483647, %v1238_v44 }
 0x13f   :  { %v383_v30 = vand.u32 2147483648, %v1238_v44  ;;  %763 = vrcp.f32 %v1306_v58  ;;  %v1321_v35 = vpop.eup %759  ;;  %v495_v32 = vmul.f32 %v1261_v57, %v494_v10  ;;  %vm600_vm10 = vcmask 326912  }
 0x140   :  { %v374_v33 = vsub.f32 1.0, %v373_v49  ;;  %v1324_v37 = vadd.f32 1.0, %v758_v24  ;;  %765 = vpow2.f32 %v693_v11  ;;  %v1330_v61 = vsel %vm1292_vm6, %v429_v15, %v425_v28 }
 0x141   :  { %v1326_v38 = vpop.eup %761  ;;  %v504_v48 = vor.u32 1.1754944e-38, %v503_v21  ;;  %v508_v39 = vmul.f32 %v1321_v35, %v1259_v53  ;;  %v518_v41 = vand.u32 2147483648, %v1259_v53  ;;  %vm378_vm11 = vweird.f32 %v756_v12 }
 0x142   :  { %v375_v19 = vmul.f32 %v756_v12, %v374_v33  ;;  %v538_v43 = vmul.f32 %v1326_v38, %v1265_v62  ;;  %767 = vrcp.f32 %v1324_v37  ;;  %vm498_vm12 = vweird.f32 %v1261_v57 }
 0x143   :  { %vm1339_vm13 = vcmp.eq.f32.partialorder %v501_v55, 8.507059e+37  ;;  %vm377_vm14 = vweird.f32 %v1238_v44  ;;  %vm1344_vm15 = vcmp.eq.f32.partialorder %v381_v16, 8.507059e+37  ;;  %v384_v47 = vor.u32 1.1754944e-38, %v383_v30  ;;  %vm1364_vm5 = vmor %vm497_vm8, %vm498_vm12 }
 0x144   :  { %vm604_vm0 = vcmask 392512   ;;  %v496_v8 = vadd.f32 %v1261_v57, %v495_v32  ;;  %v376_v23 = vadd.f32 %v756_v12, %v375_v19  ;;  %v509_v42 = vsub.f32 1.0, %v508_v39  ;;  %vm379_vm1 = vmor %vm377_vm14, %vm378_vm11 }
 0x145   :  { %v516_v50 = vand.u32 2147483647, %v1259_v53  ;;  %v764_v51 = vpop.eup %763  ;;  %v607_v52 = vperm.slane %v1330_v61, %v1102_v13  ;;  %v1353_v59 = vor.u32 1.1754944e-38, %v518_v41  ;;  %v548_v44 = vand.u32 2147483648, %v1265_v62 }
 0x146   :  { %vm437_vm2 = vweird.f32 %v1306_v58  ;;  %v766_v31 = vpop.eup %765  ;;  %v380_v20 = vsel %vm379_vm1, %v756_v12, %v376_v23  ;;  %vm512_vm3 = vweird.f32 %v1259_v53  ;;  %v539_v40 = vsub.f32 1.0, %v538_v43 }
 0x147   :  { %v433_v5 = vmul.f32 %v764_v51, %v1306_v58  ;;  %v441_v6 = vand.u32 2147483647, %v1306_v58  ;;  %vm608_vm4 = vcmask 458112   ;;  %v385_v2 = vsel %vm1344_vm15, %v384_v47, %v380_v20 }
 0x148   :  { %vm513_vm6 = vweird.f32 %v1321_v35  ;;  %v443_v10 = vand.u32 2147483648, %v1306_v58  ;;  %v1372_v11 = vadd.f32 1.0, %v766_v31  ;;  %v1374_v12 = vpop.eup %767  ;;  %v500_v22 = vsel %vm1364_vm5, %v1261_v57, %v496_v8 }
 0x149   :  { %v595_v27 = vperm.slane %v385_v2, %v1228_v36  ;;  %v510_v15 = vmul.f32 %v1321_v35, %v509_v42  ;;  %v434_v21 = vsub.f32 1.0, %v433_v5  ;;  %v553_v24 = vmul.f32 %v1374_v12, %v1324_v37 }
 0x14a   :  { %769 = vrcp.f32 %v1372_v11  ;;  %v546_v28 = vand.u32 2147483647, %v1265_v62  ;;  %v563_v55 = vand.u32 2147483648, %v1324_v37  ;;  %v540_v16 = vmul.f32 %v1326_v38, %v539_v40 }
 0x14b   :  { %v597_v49 = vsel %vm596_vm9, %v595_v27, %v1276_v63  ;;  %vm542_vm7 = vweird.f32 %v1265_v62  ;;  %v435_v36 = vmul.f32 %v764_v51, %v434_v21  ;;  %vm438_vm8 = vweird.f32 %v764_v51 }
 0x14c   :  { %v601_v57 = vsel %vm600_vm10, %v599_v34, %v597_v49  ;;  %vm1394_vm11 = vcmp.eq.f32.partialorder %v441_v6, 8.507059e+37  ;;  %v444_v32 = vor.u32 1.1754944e-38, %v443_v10  ;;  %v554_v33 = vsub.f32 1.0, %v553_v24  ;;  %vm439_vm10 = vmor %vm437_vm2, %vm438_vm8 }
 0x14d   :  { %v511_v39 = vadd.f32 %v1321_v35, %v510_v15  ;;  %vm1399_vm9 = vcmp.eq.f32.partialorder %v516_v50, 8.507059e+37  ;;  %v436_v41 = vadd.f32 %v764_v51, %v435_v36  ;;  %v505_v19 = vsel %vm1339_vm13, %v504_v48, %v500_v22  ;;  %vm1424_vm13 = vmor %vm512_vm3, %vm513_vm6 }
 0x14e   :  { %v561_v14 = vand.u32 2147483647, %v1324_v37  ;;  %vm543_vm12 = vweird.f32 %v1326_v38  ;;  %v549_v9 = vor.u32 1.1754944e-38, %v548_v44  ;;  %v555_v34 = vmul.f32 %v1374_v12, %v554_v33 }
 0x14f   :  { %vm557_vm14 = vweird.f32 %v1324_v37  ;;  %v440_v43 = vsel %vm439_vm10, %v764_v51, %v436_v41  ;;  %v541_v1 = vadd.f32 %v1326_v38, %v540_v16  ;;  %vm1412_vm15 = vcmp.eq.f32.partialorder %v546_v28, 8.507059e+37 }
 0x150   :  { %v564_v48 = vor.u32 1.1754944e-38, %v563_v55  ;;  %v605_v58 = vsel %vm604_vm0, %v603_v60, %v601_v57  ;;  %v770_v45 = vpop.eup %769  ;;  %v445_v23 = vsel %vm1394_vm11, %v444_v32, %v440_v43  ;;  %vm527_vm1 = vweird.f32 %v1372_v11  ;;  %vm1454_vm11 = vmor %vm542_vm7, %vm543_vm12 }
 0x151   :  { %vm612_vm2 = vcmask 523712   ;;  %v622_v42 = vadd.s32 4294967216, %v985_v7  ;;  %v611_v26 = vperm.slane %v445_v23, %v1304_v17  ;;  %v523_v46 = vmul.f32 %v770_v45, %v1372_v11 }
 0x152   :  { %v515_v53 = vsel %vm1424_vm13, %v1321_v35, %v511_v39  ;;  %vm1437_vm0 = vcmp.eq.f32.partialorder %v561_v14, 8.507059e+37  ;;  %vm616_vm3 = vcmask 589312   ;;  %v556_v50 = vadd.f32 %v1374_v12, %v555_v34 }
 0x153   :  { %vm558_vm5 = vweird.f32 %v1374_v12  ;;  %v609_v17 = vsel %vm608_vm4, %v607_v52, %v605_v58  ;;  %vm620_vm6 = vcmask 654912   ;;  %v524_v51 = vsub.f32 1.0, %v523_v46 }
 0x154   :  { %v613_v44 = vsel %vm612_vm2, %v611_v26, %v609_v17  ;;  %vm624_vm8 = vcmask 720512   ;;  %v626_v35 = vadd.s32 4294967208, %v985_v7  ;;  %v531_v31 = vand.u32 2147483647, %v1372_v11  ;;  %vm1475_vm7 = vmor %vm557_vm14, %vm558_vm5 }
 0x155   :  { %v533_v20 = vand.u32 2147483648, %v1372_v11  ;;  %v617_v13 = vsel %vm616_vm3, %v615_v25, %v613_v44  ;;  %v623_v61 = vperm.slane %v1316_v29, %v622_v42  ;;  %v525_v52 = vmul.f32 %v770_v45, %v524_v51 }
 0x156   :  { %vm528_vm4 = vweird.f32 %v770_v45  ;;  %v545_v5 = vsel %vm1454_vm11, %v1326_v38, %v541_v1  ;;  %v621_v62 = vsel %vm620_vm6, %v619_v4, %v617_v13  ;;  %v520_v6 = vsel %vm1399_vm9, %v1353_v59, %v515_v53 }
 0x157   :  { %v625_v0 = vsel %vm624_vm8, %v623_v61, %v621_v62  ;;  %vm628_vm10 = vcmask 786112   ;;  %v630_v25 = vadd.s32 4294967200, %v985_v7  ;;  %v526_v29 = vadd.f32 %v770_v45, %v525_v52  ;;  %vm529_vm9 = vmor %vm527_vm1, %vm528_vm4 }
 0x158   :  { %v560_v56 = vsel %vm1475_vm7, %v1374_v12, %v556_v50  ;;  %v627_v54 = vperm.slane %v505_v19, %v626_v35  ;;  %v634_v4 = vadd.s32 4294967192, %v985_v7  ;;  %v534_v37 = vor.u32 1.1754944e-38, %v533_v20 }
 0x159   :  { %vm532_vm12 = vcmp.eq.f32.partialorder %v531_v31, 8.507059e+37  ;;  %v550_v38 = vsel %vm1412_vm15, %v549_v9, %v545_v5  ;;  %v638_v59 = vadd.s32 4294967184, %v985_v7  ;;  %v530_v3 = vsel %vm529_vm9, %v770_v45, %v526_v29 }
 0x15a   :  { %v629_v2 = vsel %vm628_vm10, %v627_v54, %v625_v0  ;;  %vm632_vm14 = vcmask 851712   ;;  %v642_v10 = vadd.s32 4294967176, %v985_v7  ;;  %v535_v22 = vsel %vm532_vm12, %v534_v37, %v530_v3 }
 0x15b   :  { %v565_v12 = vsel %vm1437_vm0, %v564_v48, %v560_v56  ;;  %v631_v27 = vperm.slane %v520_v6, %v630_v25  ;;  %vm636_vm13 = vcmask 917312   ;;  %v635_v11 = vperm.slane %v535_v22, %v634_v4 }
 0x15c   :  { %vm640_vm1 = vcmask 982912   ;;  %v639_v21 = vperm.slane %v550_v38, %v638_v59  ;;  %vm644_vm15 = vcmask 1048512   ;;  %v643_v28 = vperm.slane %v565_v12, %v642_v10 }
 0x15d   :  { %v633_v15 = vsel %vm632_vm14, %v631_v27, %v629_v2 }
 0x15e   :  { %v637_v24 = vsel %vm636_vm13, %v635_v11, %v633_v15 }
 0x15f   :  { %v641_v7 = vsel %vm640_vm1, %v639_v21, %v637_v24 }
 0x160   :  { %v645_v55 = vsel %vm644_vm15, %v643_v28, %v641_v7 }
 0x161   :  { %647 = vst [vmem:[#allocation3] sm:$0x1] %v645_v55 }
 0x162   :  { %658 = dma.vmem_to_hbm [thread:$0]  %s654_s3, 16, %s656_s8, [#allocation4]  }
 0x163   :  { %795 = dma.done.wait [#allocation4], 16  }
 0x164   :  { %796 = vsyncadd [#allocation4], 4294967280 }
 0x165   :  { %663 = vsyncpa [#allocation4], 1 }

</bundles_post_ra>
